<compile_context>
chip_gen: v6e
topology: v6e:2x2x1
jax: 0.10.0
libtpu: 0.0.40
codegen_flags: <defaults>
</compile_context>

<pallas_src>
import jax
import jax.numpy as jnp
from jax.experimental import pallas as pl
from jax.experimental.pallas import tpu as pltpu


def _round_up(x: int, m: int) -> int:
    return (x + m - 1) // m * m


def _tanh_loss_kernel(z_ref, y_ref, w_ref, o_ref):
    # z_ref, y_ref: (TN, C); w_ref: (TN, 1); o_ref: (1, 8, 128)
    logits = (z_ref[...].astype(jnp.float32) + 1.0) * 0.5     # (TN, C)
    target = (y_ref[...].astype(jnp.float32) + 1.0) * 0.5     # (TN, C)

    # Numerically stable log_softmax along the class (lane) axis.
    m = jnp.max(logits, axis=-1, keepdims=True)               # (TN, 1)
    shifted = logits - m
    lse = jnp.log(jnp.sum(jnp.exp(shifted), axis=-1, keepdims=True))
    logp = shifted - lse                                      # (TN, C)

    # Per-sample soft-target cross entropy, kept in (TN, 1) layout.
    per_sample = -jnp.sum(target * logp, axis=-1, keepdims=True)   # (TN, 1)
    w = w_ref[...].astype(jnp.float32)                              # (TN, 1)
    partial = jnp.sum(per_sample * w)                               # scalar

    # Lane/sublane-dense store of the chunk partial (unmasked vst), written
    # exactly once per grid step.  The wrapper picks [:, 0, 0] and sums.
    o_ref[...] = jnp.full(o_ref.shape, partial, dtype=jnp.float32)


def tanh_loss(z, y, w=None):
    """Pallas implementation of TanhLoss.forward.

    z, y: (N, C) float arrays (f32 or bf16) in tanh range [-1, 1].
    w:    optional (N,) per-sample weights (weighted=True path).
    Returns a scalar (float32).
    """
    N, C = z.shape
    if w is None:
        w = jnp.ones((N,), dtype=jnp.float32)
    w = w.astype(jnp.float32)

    # Pick a batch tile so each input tile is ~1 MiB in the *input* dtype:
    # 2 inputs x 2 pipeline buffers -> ~4 MiB VMEM, well within scoped
    # limits on v5e/v6e and v7x's smaller 64 MiB physical VMEM.
    itemsize = max(jnp.dtype(z.dtype).itemsize, jnp.dtype(y.dtype).itemsize)
    rows_budget = max(8, ((1 << 20) // max(C * itemsize, 1)) // 8 * 8)
    tn = min(rows_budget, _round_up(N, 8))

    # Pad the batch to a multiple of the tile; padded rows get weight 0 so
    # they contribute exactly nothing to the sum.
    n_pad = _round_up(N, tn)
    if n_pad != N:
        pad = n_pad - N
        z = jnp.pad(z, ((0, pad), (0, 0)))
        y = jnp.pad(y, ((0, pad), (0, 0)))
        w = jnp.pad(w, (0, pad))
    w2d = w.reshape(n_pad, 1)
    num_chunks = n_pad // tn

    bytes_in = (z.size * z.dtype.itemsize + y.size * y.dtype.itemsize
                + w2d.size * 4)
    cost = pl.CostEstimate(
        flops=8 * n_pad * C,
        transcendentals=n_pad * C,
        bytes_accessed=bytes_in + num_chunks * 8 * 128 * 4,
    )

    partials = pl.pallas_call(
        _tanh_loss_kernel,
        out_shape=jax.ShapeDtypeStruct((num_chunks, 8, 128), jnp.float32),
        grid=(num_chunks,),
        in_specs=[
            pl.BlockSpec((tn, C), lambda i: (i, 0)),
            pl.BlockSpec((tn, C), lambda i: (i, 0)),
            pl.BlockSpec((tn, 1), lambda i: (i, 0)),
        ],
        out_specs=pl.BlockSpec((1, 8, 128), lambda i: (i, 0, 0)),
        compiler_params=pltpu.CompilerParams(
            dimension_semantics=("parallel",),
        ),
        cost_estimate=cost,
    )(z, y, w2d)

    # Tiny final reduction over per-chunk partials (done by XLA).
    return jnp.sum(partials[:, 0, 0])


def tanh_loss_ref(z, y, w=None):
    """Pure-JAX reference mirroring torch semantics (soft-target CE)."""
    logits = (z.astype(jnp.float32) + 1.0) / 2.0
    target = (y.astype(jnp.float32) + 1.0) / 2.0
    logp = jax.nn.log_softmax(logits, axis=-1)
    per_sample = -jnp.sum(target * logp, axis=-1)
    if w is not None:
        per_sample = per_sample * w.astype(jnp.float32)
    return jnp.sum(per_sample)


if __name__ == "__main__":
    key = jax.random.PRNGKey(0)
    kz, ky, kw = jax.random.split(key, 3)

    # Small, lane-friendly class count; N deliberately not a multiple of 8
    # so the batch-padding path is exercised.
    N, C = 12, 128
    z = jnp.tanh(jax.random.normal(kz, (N, C), dtype=jnp.float32))
    y = jnp.tanh(jax.random.normal(ky, (N, C), dtype=jnp.float32))
    w = jax.random.uniform(kw, (N,), dtype=jnp.float32)

    # Unweighted path (module default: weighted=False).
    out = jax.block_until_ready(tanh_loss(z, y))
    ref = tanh_loss_ref(z, y)
    assert jnp.allclose(out, ref, rtol=1e-5, atol=1e-5), (out, ref)

    # Weighted path (weighted=True).
    out_w = jax.block_until_ready(tanh_loss(z, y, w))
    ref_w = tanh_loss_ref(z, y, w)
    assert jnp.allclose(out_w, ref_w, rtol=1e-5, atol=1e-5), (out_w, ref_w)

    print("KERNEL_OK")
</pallas_src>

<mosaic_0001>
module attributes {stable_mosaic.version = 11 : i64} {
  func.func @_tanh_loss_kernel(%arg0: i32, %arg1: memref<16x128xf32, #tpu.memory_space<vmem>>, %arg2: memref<16x128xf32, #tpu.memory_space<vmem>>, %arg3: memref<16x1xf32, #tpu.memory_space<vmem>>, %arg4: memref<1x8x128xf32, #tpu.memory_space<vmem>>) attributes {dimension_semantics = [#tpu.dimension_semantics<parallel>], iteration_bounds = array<i64: 1>, scalar_prefetch = 0 : i64, scratch_operands = 0 : i64, tpu.core_type = #tpu.core_type<tc>, window_params = [{transform_indices = @transform_0, window_bounds = array<i64: 16, 128>}, {transform_indices = @transform_1, window_bounds = array<i64: 16, 128>}, {transform_indices = @transform_2, window_bounds = array<i64: 16, 1>}, {transform_indices = @transform_3, window_bounds = array<i64: 1, 8, 128>}]} {
    %c0 = arith.constant 0 : index
    %c0_0 = arith.constant 0 : index
    %0 = vector.load %arg1[%c0, %c0_0] : memref<16x128xf32, #tpu.memory_space<vmem>>, vector<16x128xf32>
    %cst = arith.constant 1.000000e+00 : f32
    %1 = vector.broadcast %cst : f32 to vector<16x128xf32>
    %2 = arith.addf %0, %1 : vector<16x128xf32>
    %cst_1 = arith.constant 5.000000e-01 : f32
    %3 = vector.broadcast %cst_1 : f32 to vector<16x128xf32>
    %4 = arith.mulf %2, %3 : vector<16x128xf32>
    %c0_2 = arith.constant 0 : index
    %c0_3 = arith.constant 0 : index
    %5 = vector.load %arg2[%c0_2, %c0_3] : memref<16x128xf32, #tpu.memory_space<vmem>>, vector<16x128xf32>
    %cst_4 = arith.constant 1.000000e+00 : f32
    %6 = vector.broadcast %cst_4 : f32 to vector<16x128xf32>
    %7 = arith.addf %5, %6 : vector<16x128xf32>
    %cst_5 = arith.constant 5.000000e-01 : f32
    %8 = vector.broadcast %cst_5 : f32 to vector<16x128xf32>
    %9 = arith.mulf %7, %8 : vector<16x128xf32>
    %cst_6 = arith.constant dense<0xFF800000> : vector<16xf32>
    %10 = vector.multi_reduction <maximumf>, %4, %cst_6 [1] : vector<16x128xf32> to vector<16xf32>
    %11 = vector.shape_cast %10 : vector<16xf32> to vector<16x1xf32>
    %12 = vector.broadcast %11 : vector<16x1xf32> to vector<16x128xf32>
    %13 = arith.subf %4, %12 : vector<16x128xf32>
    %14 = math.exp %13 : vector<16x128xf32>
    %cst_7 = arith.constant dense<0.000000e+00> : vector<16xf32>
    %15 = vector.multi_reduction <add>, %14, %cst_7 [1] : vector<16x128xf32> to vector<16xf32>
    %16 = vector.shape_cast %15 : vector<16xf32> to vector<16x1xf32>
    %17 = math.log %16 : vector<16x1xf32>
    %18 = vector.broadcast %17 : vector<16x1xf32> to vector<16x128xf32>
    %19 = arith.subf %13, %18 : vector<16x128xf32>
    %20 = arith.mulf %9, %19 : vector<16x128xf32>
    %cst_8 = arith.constant dense<0.000000e+00> : vector<16xf32>
    %21 = vector.multi_reduction <add>, %20, %cst_8 [1] : vector<16x128xf32> to vector<16xf32>
    %22 = vector.shape_cast %21 : vector<16xf32> to vector<16x1xf32>
    %cst_9 = arith.constant 0.000000e+00 : f32
    %23 = vector.broadcast %cst_9 : f32 to vector<16x1xf32>
    %24 = arith.subf %23, %22 : vector<16x1xf32>
    %c0_10 = arith.constant 0 : index
    %c0_11 = arith.constant 0 : index
    %25 = vector.load %arg3[%c0_10, %c0_11] : memref<16x1xf32, #tpu.memory_space<vmem>>, vector<16x1xf32>
    %26 = arith.mulf %24, %25 : vector<16x1xf32>
    %27 = vector.shape_cast %26 : vector<16x1xf32> to vector<1x16x1xf32>
    %cst_12 = arith.constant dense<0.000000e+00> : vector<1xf32>
    %28 = vector.multi_reduction <add>, %27, %cst_12 [1, 2] : vector<1x16x1xf32> to vector<1xf32>
    %29 = vector.shape_cast %28 : vector<1xf32> to vector<1x1x1xf32>
    %30 = vector.extract %29[0, 0, 0] : f32 from vector<1x1x1xf32>
    %31 = vector.broadcast %30 : f32 to vector<1x8x128xf32>
    %c0_13 = arith.constant 0 : index
    %c0_14 = arith.constant 0 : index
    %c0_15 = arith.constant 0 : index
    %32 = vector.load %arg4[%c0_13, %c0_14, %c0_15] : memref<1x8x128xf32, #tpu.memory_space<vmem>>, vector<1x8x128xf32>
    tpu.vector_store %arg4[%c0_13, %c0_14, %c0_15], %31 {strides = array<i32>} : memref<1x8x128xf32, #tpu.memory_space<vmem>>, vector<1x8x128xf32>,
    return
  }
  func.func @transform_0(%arg0: i32) -> (i32, i32) {
    %c0_i32 = arith.constant 0 : i32
    %c0_i32_0 = arith.constant 0 : i32
    return %arg0, %c0_i32 : i32, i32
  }
  func.func @transform_1(%arg0: i32) -> (i32, i32) {
    %c0_i32 = arith.constant 0 : i32
    %c0_i32_0 = arith.constant 0 : i32
    return %arg0, %c0_i32 : i32, i32
  }
  func.func @transform_2(%arg0: i32) -> (i32, i32) {
    %c0_i32 = arith.constant 0 : i32
    %c0_i32_0 = arith.constant 0 : i32
    return %arg0, %c0_i32 : i32, i32
  }
  func.func @transform_3(%arg0: i32) -> (i32, i32, i32) {
    %c0_i32 = arith.constant 0 : i32
    %c0_i32_0 = arith.constant 0 : i32
    %c0_i32_1 = arith.constant 0 : i32
    return %arg0, %c0_i32, %c0_i32_0 : i32, i32, i32
  }
}

</mosaic_0001>

<bundles_post_ra>
// kernel: tpu_custom_call.1
= control target key start
LH: loop header
LB: loop body
LE: loop exit
PB: predicated region body
PF: predicated region fallthrough
CT: control target
= control target key end

     0   :  { %8 = vsyncpa [#allocation3], 0  ;;  %s203_s0 = inlined_call_operand.vmem [shape: f32[16,128], index: 0, kind: input, shape index: {}]   ;;  %s204_s1 = inlined_call_operand.hbm [shape: f32[16,128], index: 1, kind: input, shape index: {}]   ;;  %s205_s2 = inlined_call_operand.vmem [shape: f32[16,1], index: 2, kind: input, shape index: {}]   ;;  %s206_s3 = inlined_call_operand.hbm [shape: f32[1,8,128], index: 3, kind: output, shape index: {}]  }
   0x1   :  { %9 = vsyncpa [#allocation4], 0  ;;  %s161_s12 = smov [#allocation2]  }
   0x2   :  { %s17_s13 = sshll.u32 %s161_s12, 4  ;;  %s18_s13 = int_to_ptr.vmem [resolvable:$true] %s17_s13 }
   0x3   :  { %s125_s14 = scalar_lea.vmem %s18_s13, 256  ;;  %p130_p1 = scmp.lt.s32.totalorder %s18_s13, %s18_s13 }
   0x4   :  { %p126_p0 = scmp.ne.s32.totalorder %s18_s13, %s125_s14  ;;  %p131_p2 = scmp.lt.s32.totalorder %s125_s14, %s125_s14 }
   0x6   :  { %p132_p3 = por %p131_p2, %p130_p1 }
   0x8   :  { %p133_p4 = pnand %p132_p3, %p126_p0 }
   0xa   :  { %136 = shalt.err (!%p133_p4)
}
   0xb   :  { %s162_s15 = smov 128   ;;  %s163_s16 = smov 8  }
   0xc   :  { %23 = dma.hbm_to_vmem [thread:$0]  %s204_s1, 256, %s18_s13, [#allocation3], %s162_s15, %s162_s15, %s163_s16  }
   0xd   :  { %157 = dma.done.wait [#allocation3], 256  }
   0xe   :  { %158 = vsyncadd [#allocation3], 4294967040  ;;  %v29_v0 = vld [vmem:[%s203_s0] sm:$0xff]  ;;  %v30_v1 = vld [vmem:[%s203_s0 + $0x8] sm:$0xff]  ;;  %vm73_vm0 = vcmask 7168   ;;  %s164_s25 = smov [#allocation5]  }
   0xf   :  { %v31_v2 = vadd.f32 1.0, %v29_v0  ;;  %v32_v3 = vadd.f32 1.0, %v30_v1  ;;  %v35_v16 = vld [vmem:[#allocation2] sm:$0xff]  ;;  %v36_v18 = vld [vmem:[#allocation2 + $0x8] sm:$0xff]  ;;  %s94_s26 = sshll.u32 %s164_s25, 4  ;;  %s95_s26 = int_to_ptr.vmem [resolvable:$true] %s94_s26 }
  0x10   :  { %v37_v17 = vadd.f32 1.0, %v35_v16  ;;  %v38_v22 = vadd.f32 1.0, %v36_v18  ;;  %v69_v32 = vld [vmem:[%s205_s2] sm:$0xff]  ;;  %v70_v33 = vld [vmem:[%s205_s2 + $0x8] sm:$0xff]  ;;  %s137_s27 = scalar_lea.vmem %s95_s26, 128  ;;  %p142_p6 = scmp.lt.s32.totalorder %s95_s26, %s95_s26 }
  0x11   :  { %v33_v4 = vmul.f32 0.5, %v31_v2  ;;  %v34_v5 = vmul.f32 0.5, %v32_v3  ;;  %p138_p5 = scmp.ne.s32.totalorder %s95_s26, %s137_s27  ;;  %p143_p7 = scmp.lt.s32.totalorder %s137_s27, %s137_s27 }
  0x12   :  { %v39_v21 = vmul.f32 0.5, %v37_v17  ;;  %v40_v27 = vmul.f32 0.5, %v38_v22 }
  0x13   :  { %41 = vmax.xlane.f32.xlu0 %v33_v4  ;;  %p144_p8 = por %p143_p7, %p142_p6 }
  0x15   :  { %p145_p9 = pnand %p144_p8, %p138_p5 }
  0x17   :  { %43 = vmax.xlane.f32.xlu0 %v34_v5 }
  0x9c   :  { %v42_v6 = vpop.xlane.xlu0 %41 }
  0x9d   :  { %v45_v7 = vsub.f32 %v33_v4, %v42_v6 }
  0x9f   :  { %v47_v8 = vmul.f32 1.442695, %v45_v7 }
  0xa0   :  { %v44_v9 = vpop.xlane.xlu0 %43 }
  0xa1   :  { %v46_v10 = vsub.f32 %v34_v5, %v44_v9  ;;  %109 = vpow2.f32 %v47_v8 }
  0xa3   :  { %v49_v11 = vmul.f32 1.442695, %v46_v10 }
  0xa5   :  { %111 = vpow2.f32 %v49_v11 }
  0xae   :  { %v110_v12 = vpop.eup %109 }
  0xaf   :  { %51 = vadd.xlane.f32.xlu1 %v110_v12 }
  0xb2   :  { %v112_v13 = vpop.eup %111 }
  0xb3   :  { %53 = vadd.xlane.f32.xlu1 %v112_v13 }
 0x138   :  { %v52_v14 = vpop.xlane.xlu1 %51 }
 0x139   :  { %113 = vlog2.f32 %v52_v14 }
 0x13c   :  { %v54_v15 = vpop.xlane.xlu1 %53 }
 0x13d   :  { %115 = vlog2.f32 %v54_v15 }
 0x146   :  { %v114_v19 = vpop.eup %113 }
 0x147   :  { %v56_v20 = vmul.f32 0.6931472, %v114_v19 }
 0x149   :  { %v59_v23 = vsub.f32 %v45_v7, %v56_v20 }
 0x14a   :  { %v116_v24 = vpop.eup %115 }
 0x14b   :  { %v58_v25 = vmul.f32 0.6931472, %v116_v24  ;;  %v61_v26 = vmul.f32 %v59_v23, %v39_v21 }
 0x14d   :  { %63 = vadd.xlane.f32.xlu0 %v61_v26  ;;  %v60_v28 = vsub.f32 %v46_v10, %v58_v25 }
 0x14f   :  { %v62_v29 = vmul.f32 %v60_v28, %v40_v27 }
 0x151   :  { %65 = vadd.xlane.f32.xlu1 %v62_v29 }
 0x1d6   :  { %v64_v30 = vpop.xlane.xlu0 %63 }
 0x1d7   :  { %v67_v31 = vsub.f32 0.0, %v64_v30 }
 0x1d9   :  { %v71_v35 = vmul.f32 %v69_v32, %v67_v31 }
 0x1da   :  { %v66_v34 = vpop.xlane.xlu1 %65 }
 0x1db   :  { %v68_v36 = vsub.f32 0.0, %v66_v34  ;;  %v74_v38 = vsel %vm73_vm0, %v71_v35, 0.0 }
 0x1dd   :  { %v72_v37 = vmul.f32 %v70_v33, %v68_v36 }
 0x1df   :  { %v75_v39 = vsel %vm73_vm0, %v72_v37, 0.0 }
 0x1e0   :  { %v76_v40 = vadd.f32 %v75_v39, %v74_v38 }
 0x1e2   :  { %77 = vadd.xlane.f32.xlu0 %v76_v40 }
 0x26b   :  { %v78_v41 = vpop.xlane.xlu0 %77 }
 0x26c   :  { %v79_v42 = vrot.slane %v78_v41, 4 }
 0x26e   :  { %v80_v43 = vadd.f32 %v79_v42, %v78_v41 }
 0x270   :  { %v81_v44 = vrot.slane %v80_v43, 2 }
 0x272   :  { %v82_v45 = vadd.f32 %v81_v44, %v80_v43 }
 0x274   :  { %v83_v46 = vrot.slane %v82_v45, 1 }
 0x276   :  { %v84_v47 = vadd.f32 %v83_v46, %v82_v45 }
 0x278   :  { %103 = vpush %v84_v47 }
 0x2a9   :  { %s104_s2 = spop %103 }
 0x2aa   :  { %v86_v48 = vstv %s104_s2 }
 0x2ab   :  { %87 = vst [vmem:[#allocation5] sm:$0xff] %v86_v48 }
 0x2ac   :  { %148 = shalt.err (!%p145_p9)
}
 0x2ad   :  { %97 = dma.vmem_to_hbm [thread:$0]  %s95_s26, 128, %s206_s3, [#allocation4]  }
 0x2ae   :  { %159 = dma.done.wait [#allocation4], 128  }
 0x2af   :  { %160 = vsyncadd [#allocation4], 4294967168 }
 0x2b0   :  { %101 = vsyncpa [#allocation3], 1 }
 0x2b1   :  { %102 = vsyncpa [#allocation4], 1 }

</bundles_post_ra>
